<compile_context>
chip_gen: v7x
topology: tpu7x:2x2x1
jax: 0.10.0
libtpu: 0.0.40
codegen_flags: <defaults>
</compile_context>

<pallas_src>
import functools

import jax
import jax.numpy as jnp
from jax.experimental import pallas as pl
from jax.experimental.pallas import tpu as pltpu

LOG_STD_MIN = -20.0
LOG_STD_MAX = 2.0
LANE = 128


def _round_up(x, m):
    return (x + m - 1) // m * m


def _policy_kernel(x_ref, w1_ref, b1_ref, w2_ref, b2_ref, wh_ref, bh_ref,
                   out_ref, *, num_actions):
    # bf16 operands for the MXU, f32 accumulation + f32 epilogue.
    x = x_ref[...].astype(jnp.bfloat16)

    h1 = jnp.dot(x, w1_ref[...], preferred_element_type=jnp.float32) + b1_ref[...]
    h1 = jnp.maximum(h1, 0.0).astype(jnp.bfloat16)

    h2 = jnp.dot(h1, w2_ref[...], preferred_element_type=jnp.float32) + b2_ref[...]
    h2 = jnp.maximum(h2, 0.0).astype(jnp.bfloat16)

    # Fused heads: one lane-dense (tile_b, N_pad) matmul instead of two (B, A).
    head = jnp.dot(h2, wh_ref[...], preferred_element_type=jnp.float32) + bh_ref[...]

    # Clamp only the log_std columns [A, 2A) of the fused slab.
    col = jax.lax.broadcasted_iota(jnp.int32, head.shape, 1)
    is_log_std = (col >= num_actions) & (col < 2 * num_actions)
    head = jnp.where(is_log_std,
                     jnp.clip(head, LOG_STD_MIN, LOG_STD_MAX),
                     head)

    out_ref[...] = head.astype(out_ref.dtype)


def prepare_kernel_params(params, num_actions):
    """One-time layout transform: fuse + lane-pad heads, cast weights to bf16."""
    n_pad = max(LANE, _round_up(2 * num_actions, LANE))
    wh = jnp.concatenate([params["wm"], params["ws"]], axis=1)
    wh = jnp.pad(wh, ((0, 0), (0, n_pad - 2 * num_actions)))
    bh = jnp.concatenate([params["bm"], params["bs"]], axis=1)
    bh = jnp.pad(bh, ((0, 0), (0, n_pad - 2 * num_actions)))
    return {
        "w1": params["w1"].astype(jnp.bfloat16),
        "b1": params["b1"].astype(jnp.float32),
        "w2": params["w2"].astype(jnp.bfloat16),
        "b2": params["b2"].astype(jnp.float32),
        "wh": wh.astype(jnp.bfloat16),
        "bh": bh.astype(jnp.float32),
    }


def policy_network_forward(state, kparams, num_actions, *, block_b=128):
    """Full MLP forward in one pallas_call, tiled over the batch dimension."""
    B, num_inputs = state.shape
    hidden = kparams["w1"].shape[1]
    n_pad = kparams["wh"].shape[1]

    # Batch tile: multiple of 8 sublanes, capped at block_b rows.
    tile_b = min(block_b, _round_up(B, 8))
    b_pad = _round_up(B, tile_b)
    if b_pad != B:
        state = jnp.pad(state, ((0, b_pad - B), (0, 0)))

    kernel = functools.partial(_policy_kernel, num_actions=num_actions)
    const = lambda i: (0, 0)   # resident weights/biases: DMA'd once, kept in VMEM

    out = pl.pallas_call(
        kernel,
        out_shape=jax.ShapeDtypeStruct((b_pad, n_pad), jnp.float32),
        grid_spec=pltpu.PrefetchScalarGridSpec(
            num_scalar_prefetch=0,
            grid=(b_pad // tile_b,),
            in_specs=[
                pl.BlockSpec((tile_b, num_inputs), lambda i: (i, 0)),
                pl.BlockSpec((num_inputs, hidden), const),
                pl.BlockSpec((1, hidden), const),
                pl.BlockSpec((hidden, hidden), const),
                pl.BlockSpec((1, hidden), const),
                pl.BlockSpec((hidden, n_pad), const),
                pl.BlockSpec((1, n_pad), const),
            ],
            out_specs=pl.BlockSpec((tile_b, n_pad), lambda i: (i, 0)),
        ),
        compiler_params=pltpu.CompilerParams(
            dimension_semantics=("parallel",),
        ),
    )(state, kparams["w1"], kparams["b1"], kparams["w2"], kparams["b2"],
      kparams["wh"], kparams["bh"])

    mean = out[:B, :num_actions]
    log_std = out[:B, num_actions:2 * num_actions]
    return mean, log_std


def init_policy_params(key, num_inputs, num_actions, hidden_size, init_w=0.003):
    """Mirrors the PyTorch module's init.  Weights stored transposed (in, out);
    biases as (1, out) so everything in-kernel stays 2D."""
    ks = jax.random.split(key, 8)

    def uni(k, shape, bound):
        return jax.random.uniform(k, shape, jnp.float32, -bound, bound)

    bnd1 = 1.0 / (num_inputs ** 0.5)
    bnd2 = 1.0 / (hidden_size ** 0.5)
    return {
        "w1": uni(ks[0], (num_inputs, hidden_size), bnd1),
        "b1": uni(ks[1], (1, hidden_size), bnd1),
        "w2": uni(ks[2], (hidden_size, hidden_size), bnd2),
        "b2": uni(ks[3], (1, hidden_size), bnd2),
        "wm": uni(ks[4], (hidden_size, num_actions), init_w),
        "bm": uni(ks[5], (1, num_actions), init_w),
        "ws": uni(ks[6], (hidden_size, num_actions), init_w),
        "bs": uni(ks[7], (1, num_actions), init_w),
    }


def _reference_forward(state, params):
    h1 = jnp.maximum(state @ params["w1"] + params["b1"], 0.0)
    h2 = jnp.maximum(h1 @ params["w2"] + params["b2"], 0.0)
    mean = h2 @ params["wm"] + params["bm"]
    log_std = jnp.clip(h2 @ params["ws"] + params["bs"], LOG_STD_MIN, LOG_STD_MAX)
    return mean, log_std


if __name__ == "__main__":
    key = jax.random.PRNGKey(0)
    k_param, k_state = jax.random.split(key)

    batch = 8
    num_inputs = 32
    num_actions = 8
    hidden_size = 64

    params = init_policy_params(k_param, num_inputs, num_actions, hidden_size)
    kparams = prepare_kernel_params(params, num_actions)
    state = jax.random.normal(k_state, (batch, num_inputs), jnp.float32)

    mean, log_std = policy_network_forward(state, kparams, num_actions)
    jax.block_until_ready((mean, log_std))

    # Correctness check against a pure-f32 JAX reference (kernel uses bf16
    # MXU operands with f32 accumulation -> loosened tolerance).
    ref_mean, ref_log_std = _reference_forward(state, params)
    assert mean.shape == (batch, num_actions)
    assert log_std.shape == (batch, num_actions)
    assert jnp.allclose(mean, ref_mean, atol=1e-2, rtol=1e-2)
    assert jnp.allclose(log_std, ref_log_std, atol=1e-2, rtol=1e-2)
    assert float(log_std.min()) >= LOG_STD_MIN and float(log_std.max()) <= LOG_STD_MAX

    print("KERNEL_OK")
</pallas_src>

<mosaic_0001>
module attributes {stable_mosaic.version = 11 : i64} {
  func.func @_policy_kernel(%arg0: i32, %arg1: memref<8x32xf32, #tpu.memory_space<vmem>>, %arg2: memref<32x64xbf16, #tpu.memory_space<vmem>>, %arg3: memref<1x64xf32, #tpu.memory_space<vmem>>, %arg4: memref<64x64xbf16, #tpu.memory_space<vmem>>, %arg5: memref<1x64xf32, #tpu.memory_space<vmem>>, %arg6: memref<64x128xbf16, #tpu.memory_space<vmem>>, %arg7: memref<1x128xf32, #tpu.memory_space<vmem>>, %arg8: memref<8x128xf32, #tpu.memory_space<vmem>>) attributes {dimension_semantics = [#tpu.dimension_semantics<parallel>], iteration_bounds = array<i64: 1>, scalar_prefetch = 0 : i64, scratch_operands = 0 : i64, tpu.core_type = #tpu.core_type<tc>, window_params = [{transform_indices = @transform_0, window_bounds = array<i64: 8, 32>}, {pipeline_mode = #tpu.pipeline_mode<synchronous>, transform_indices = @transform_1, window_bounds = array<i64: 32, 64>}, {pipeline_mode = #tpu.pipeline_mode<synchronous>, transform_indices = @transform_2, window_bounds = array<i64: 1, 64>}, {pipeline_mode = #tpu.pipeline_mode<synchronous>, transform_indices = @transform_3, window_bounds = array<i64: 64, 64>}, {pipeline_mode = #tpu.pipeline_mode<synchronous>, transform_indices = @transform_4, window_bounds = array<i64: 1, 64>}, {pipeline_mode = #tpu.pipeline_mode<synchronous>, transform_indices = @transform_5, window_bounds = array<i64: 64, 128>}, {pipeline_mode = #tpu.pipeline_mode<synchronous>, transform_indices = @transform_6, window_bounds = array<i64: 1, 128>}, {transform_indices = @transform_7, window_bounds = array<i64: 8, 128>}]} {
    %c0 = arith.constant 0 : index
    %c0_0 = arith.constant 0 : index
    %0 = vector.load %arg1[%c0, %c0_0] : memref<8x32xf32, #tpu.memory_space<vmem>>, vector<8x32xf32>
    %1 = arith.truncf %0 : vector<8x32xf32> to vector<8x32xbf16>
    %c0_1 = arith.constant 0 : index
    %c0_2 = arith.constant 0 : index
    %2 = vector.load %arg2[%c0_1, %c0_2] : memref<32x64xbf16, #tpu.memory_space<vmem>>, vector<32x64xbf16>
    %cst = arith.constant dense<0.000000e+00> : vector<8x64xf32>
    %3 = tpu.matmul %1, %2, %cst {dimension_numbers = #tpu.dot_dimension_numbers<[1], [0], [0], [1], [0, 0, 1, 1], [], []>} : vector<8x32xbf16>, vector<32x64xbf16>, vector<8x64xf32> -> vector<8x64xf32>
    %c0_3 = arith.constant 0 : index
    %c0_4 = arith.constant 0 : index
    %4 = vector.load %arg3[%c0_3, %c0_4] : memref<1x64xf32, #tpu.memory_space<vmem>>, vector<1x64xf32>
    %5 = vector.broadcast %4 : vector<1x64xf32> to vector<8x64xf32>
    %6 = arith.addf %3, %5 : vector<8x64xf32>
    %cst_5 = arith.constant 0.000000e+00 : f32
    %7 = vector.broadcast %cst_5 : f32 to vector<8x64xf32>
    %8 = arith.maximumf %6, %7 : vector<8x64xf32>
    %9 = arith.truncf %8 : vector<8x64xf32> to vector<8x64xbf16>
    %c0_6 = arith.constant 0 : index
    %c0_7 = arith.constant 0 : index
    %10 = vector.load %arg4[%c0_6, %c0_7] : memref<64x64xbf16, #tpu.memory_space<vmem>>, vector<64x64xbf16>
    %cst_8 = arith.constant dense<0.000000e+00> : vector<8x64xf32>
    %11 = tpu.matmul %9, %10, %cst_8 {dimension_numbers = #tpu.dot_dimension_numbers<[1], [0], [0], [1], [0, 0, 1, 1], [], []>} : vector<8x64xbf16>, vector<64x64xbf16>, vector<8x64xf32> -> vector<8x64xf32>
    %c0_9 = arith.constant 0 : index
    %c0_10 = arith.constant 0 : index
    %12 = vector.load %arg5[%c0_9, %c0_10] : memref<1x64xf32, #tpu.memory_space<vmem>>, vector<1x64xf32>
    %13 = vector.broadcast %12 : vector<1x64xf32> to vector<8x64xf32>
    %14 = arith.addf %11, %13 : vector<8x64xf32>
    %cst_11 = arith.constant 0.000000e+00 : f32
    %15 = vector.broadcast %cst_11 : f32 to vector<8x64xf32>
    %16 = arith.maximumf %14, %15 : vector<8x64xf32>
    %17 = arith.truncf %16 : vector<8x64xf32> to vector<8x64xbf16>
    %c0_12 = arith.constant 0 : index
    %c0_13 = arith.constant 0 : index
    %18 = vector.load %arg6[%c0_12, %c0_13] : memref<64x128xbf16, #tpu.memory_space<vmem>>, vector<64x128xbf16>
    %cst_14 = arith.constant dense<0.000000e+00> : vector<8x128xf32>
    %19 = tpu.matmul %17, %18, %cst_14 {dimension_numbers = #tpu.dot_dimension_numbers<[1], [0], [0], [1], [0, 0, 1, 1], [], []>} : vector<8x64xbf16>, vector<64x128xbf16>, vector<8x128xf32> -> vector<8x128xf32>
    %c0_15 = arith.constant 0 : index
    %c0_16 = arith.constant 0 : index
    %20 = vector.load %arg7[%c0_15, %c0_16] : memref<1x128xf32, #tpu.memory_space<vmem>>, vector<1x128xf32>
    %21 = vector.broadcast %20 : vector<1x128xf32> to vector<8x128xf32>
    %22 = arith.addf %19, %21 : vector<8x128xf32>
    %23 = tpu.iota {dimensions = array<i32: 1>} : vector<8x128xi32>
    %c8_i32 = arith.constant 8 : i32
    %24 = vector.broadcast %c8_i32 : i32 to vector<8x128xi32>
    %25 = arith.cmpi sge, %23, %24 : vector<8x128xi32>
    %c16_i32 = arith.constant 16 : i32
    %26 = vector.broadcast %c16_i32 : i32 to vector<8x128xi32>
    %27 = arith.cmpi slt, %23, %26 : vector<8x128xi32>
    %28 = arith.andi %25, %27 : vector<8x128xi1>
    %cst_17 = arith.constant -2.000000e+01 : f32
    %cst_18 = arith.constant 2.000000e+00 : f32
    %29 = vector.broadcast %cst_17 : f32 to vector<8x128xf32>
    %30 = arith.maximumf %29, %22 : vector<8x128xf32>
    %31 = vector.broadcast %cst_18 : f32 to vector<8x128xf32>
    %32 = arith.minimumf %31, %30 : vector<8x128xf32>
    %33 = arith.select %28, %32, %22 : vector<8x128xi1>, vector<8x128xf32>
    %c0_19 = arith.constant 0 : index
    %c0_20 = arith.constant 0 : index
    %34 = vector.load %arg8[%c0_19, %c0_20] : memref<8x128xf32, #tpu.memory_space<vmem>>, vector<8x128xf32>
    tpu.vector_store %arg8[%c0_19, %c0_20], %33 {strides = array<i32>} : memref<8x128xf32, #tpu.memory_space<vmem>>, vector<8x128xf32>,
    return
  }
  func.func @transform_0(%arg0: i32) -> (i32, i32) {
    %c0_i32 = arith.constant 0 : i32
    %c0_i32_0 = arith.constant 0 : i32
    return %arg0, %c0_i32 : i32, i32
  }
  func.func @transform_1(%arg0: i32) -> (i32, i32) {
    %c0_i32 = arith.constant 0 : i32
    %c0_i32_0 = arith.constant 0 : i32
    %c0_i32_1 = arith.constant 0 : i32
    return %c0_i32, %c0_i32_0 : i32, i32
  }
  func.func @transform_2(%arg0: i32) -> (i32, i32) {
    %c0_i32 = arith.constant 0 : i32
    %c0_i32_0 = arith.constant 0 : i32
    %c0_i32_1 = arith.constant 0 : i32
    return %c0_i32, %c0_i32_0 : i32, i32
  }
  func.func @transform_3(%arg0: i32) -> (i32, i32) {
    %c0_i32 = arith.constant 0 : i32
    %c0_i32_0 = arith.constant 0 : i32
    %c0_i32_1 = arith.constant 0 : i32
    return %c0_i32, %c0_i32_0 : i32, i32
  }
  func.func @transform_4(%arg0: i32) -> (i32, i32) {
    %c0_i32 = arith.constant 0 : i32
    %c0_i32_0 = arith.constant 0 : i32
    %c0_i32_1 = arith.constant 0 : i32
    return %c0_i32, %c0_i32_0 : i32, i32
  }
  func.func @transform_5(%arg0: i32) -> (i32, i32) {
    %c0_i32 = arith.constant 0 : i32
    %c0_i32_0 = arith.constant 0 : i32
    %c0_i32_1 = arith.constant 0 : i32
    return %c0_i32, %c0_i32_0 : i32, i32
  }
  func.func @transform_6(%arg0: i32) -> (i32, i32) {
    %c0_i32 = arith.constant 0 : i32
    %c0_i32_0 = arith.constant 0 : i32
    %c0_i32_1 = arith.constant 0 : i32
    return %c0_i32, %c0_i32_0 : i32, i32
  }
  func.func @transform_7(%arg0: i32) -> (i32, i32) {
    %c0_i32 = arith.constant 0 : i32
    %c0_i32_0 = arith.constant 0 : i32
    return %arg0, %c0_i32 : i32, i32
  }
}

</mosaic_0001>

<bundles_post_ra>
// kernel: tpu_custom_call.1
= control target key start
LH: loop header
LB: loop body
LE: loop exit
PB: predicated region body
PF: predicated region fallthrough
CT: control target
= control target key end

     0   :  { %12 = vsyncpa [#allocation3], 0  ;;  %s675_s0 = inlined_call_operand.hbm [shape: f32[8,32], index: 0, kind: input, shape index: {}]   ;;  %s676_s1 = inlined_call_operand.hbm [shape: bf16[32,64], index: 1, kind: input, shape index: {}]   ;;  %s677_s2 = inlined_call_operand.vmem [shape: f32[1,64], index: 2, kind: input, shape index: {}]   ;;  %s678_s3 = inlined_call_operand.hbm [shape: bf16[64,64], index: 3, kind: input, shape index: {}]   ;;  %s679_s4 = inlined_call_operand.vmem [shape: f32[1,64], index: 4, kind: input, shape index: {}]   ;;  %s680_s5 = inlined_call_operand.hbm [shape: bf16[64,128], index: 5, kind: input, shape index: {}]   ;;  %s681_s6 = inlined_call_operand.vmem [shape: f32[1,128], index: 6, kind: input, shape index: {}]   ;;  %s682_s7 = inlined_call_operand.hbm [shape: f32[8,128], index: 7, kind: output, shape index: {}]  }
   0x1   :  { %13 = vsyncpa [#allocation6], 0 }
   0x2   :  { %14 = vsyncpa [#allocation9], 0 }
   0x3   :  { %15 = vsyncpa [#allocation4], 0  ;;  %s543_s24 = smov [#allocation5]   ;;  %s425_s28 = scalar_lea.hbm %s676_s1, 256 }
   0x4   :  { %s31_s25 = sshll.u32 %s543_s24, 4  ;;  %p426_p0 = scmp.ne.s32.totalorder %s676_s1, %s425_s28  ;;  %s32_s25 = int_to_ptr.vmem [resolvable:$true] %s31_s25 }
   0x5   :  { %p429_p1 = scmp.lt.u32.totalorder %s425_s28, %s676_s1 }
   0x7   :  { %p431_p2 = pnand %p429_p1, %p426_p0 }
   0x9   :  { %434 = shalt.err (!%p431_p2)
}
   0xa   :  { %s435_s10 = scalar_lea.vmem %s32_s25, 256  ;;  %p440_p4 = scmp.lt.s32.totalorder %s32_s25, %s32_s25 }
   0xb   :  { %p436_p3 = scmp.ne.s32.totalorder %s32_s25, %s435_s10  ;;  %p441_p5 = scmp.lt.s32.totalorder %s435_s10, %s435_s10 }
   0xd   :  { %p442_p6 = por %p441_p5, %p440_p4 }
   0xf   :  { %p443_p7 = pnand %p442_p6, %p436_p3 }
  0x11   :  { %446 = shalt.err (!%p443_p7)
}
  0x12   :  { %s544_s11 = smov 64   ;;  %s545_s12 = smov 4  }
  0x13   :  { %37 = dma.hbm_to_vmem [thread:$0]  %s676_s1, 256, %s32_s25, [#allocation6], %s544_s11, %s544_s11, %s545_s12  }
  0x14   :  { %s546_s15 = smov [#allocation2]   ;;  %s547_s17 = smov [#allocation7]  }
  0x15   :  { %s22_s16 = sshll.u32 %s546_s15, 4  ;;  %s45_s18 = sshll.u32 %s547_s17, 4  ;;  %s23_s16 = int_to_ptr.vmem [resolvable:$true] %s22_s16  ;;  %s46_s18 = int_to_ptr.vmem [resolvable:$true] %s45_s18 }
  0x16   :  { %s447_s21 = scalar_lea.hbm %s675_s0, 128 }
  0x17   :  { %p448_p8 = scmp.ne.s32.totalorder %s675_s0, %s447_s21  ;;  %p451_p9 = scmp.lt.u32.totalorder %s447_s21, %s675_s0 }
  0x19   :  { %p453_p10 = pnand %p451_p9, %p448_p8 }
  0x1b   :  { %456 = shalt.err (!%p453_p10)
}
  0x1c   :  { %s457_s1 = scalar_lea.vmem %s23_s16, 128  ;;  %p462_p12 = scmp.lt.s32.totalorder %s23_s16, %s23_s16 }
  0x1d   :  { %p458_p11 = scmp.ne.s32.totalorder %s23_s16, %s457_s1  ;;  %p463_p13 = scmp.lt.s32.totalorder %s457_s1, %s457_s1 }
  0x1f   :  { %p464_p0 = por %p463_p13, %p462_p12 }
  0x21   :  { %p465_p1 = pnand %p464_p0, %p458_p11 }
  0x23   :  { %468 = shalt.err (!%p465_p1)
}
  0x24   :  { %25 = dma.hbm_to_vmem [thread:$0]  %s675_s0, 128, %s23_s16, [#allocation3]  }
  0x25   :  { %s469_s30 = scalar_lea.hbm %s678_s3, 512 }
  0x26   :  { %p470_p2 = scmp.ne.s32.totalorder %s678_s3, %s469_s30  ;;  %p473_p3 = scmp.lt.u32.totalorder %s469_s30, %s678_s3 }
  0x28   :  { %p475_p4 = pnand %p473_p3, %p470_p2 }
  0x2a   :  { %478 = shalt.err (!%p475_p4)
}
  0x2b   :  { %s479_s14 = scalar_lea.vmem %s46_s18, 512  ;;  %p484_p6 = scmp.lt.s32.totalorder %s46_s18, %s46_s18 }
  0x2c   :  { %p480_p5 = scmp.ne.s32.totalorder %s46_s18, %s479_s14  ;;  %p485_p7 = scmp.lt.s32.totalorder %s479_s14, %s479_s14 }
  0x2e   :  { %p486_p8 = por %p485_p7, %p484_p6 }
  0x30   :  { %p487_p9 = pnand %p486_p8, %p480_p5 }
  0x32   :  { %490 = shalt.err (!%p487_p9)
}
  0x33   :  { %51 = dma.hbm_to_vmem [thread:$0]  %s678_s3, 512, %s46_s18, [#allocation6], %s544_s11, %s544_s11, %s545_s12  }
  0x34   :  { %s548_s16 = smov [#allocation8]   ;;  %s491_s21 = scalar_lea.hbm %s680_s5, 512 }
  0x35   :  { %s59_s17 = sshll.u32 %s548_s16, 4  ;;  %p492_p10 = scmp.ne.s32.totalorder %s680_s5, %s491_s21  ;;  %s60_s17 = int_to_ptr.vmem [resolvable:$true] %s59_s17 }
  0x36   :  { %p495_p11 = scmp.lt.u32.totalorder %s491_s21, %s680_s5 }
  0x38   :  { %p497_p12 = pnand %p495_p11, %p492_p10 }
  0x3a   :  { %500 = shalt.err (!%p497_p12)
}
  0x3b   :  { %s501_s1 = scalar_lea.vmem %s60_s17, 512  ;;  %p506_p0 = scmp.lt.s32.totalorder %s60_s17, %s60_s17 }
  0x3c   :  { %p502_p13 = scmp.ne.s32.totalorder %s60_s17, %s501_s1  ;;  %p507_p1 = scmp.lt.s32.totalorder %s501_s1, %s501_s1 }
  0x3e   :  { %p508_p2 = por %p507_p1, %p506_p0 }
  0x40   :  { %p509_p3 = pnand %p508_p2, %p502_p13 }
  0x42   :  { %512 = shalt.err (!%p509_p3)
}
  0x43   :  { %65 = dma.hbm_to_vmem [thread:$0]  %s680_s5, 512, %s60_s17, [#allocation9], %s544_s11, %s544_s11, %s545_s12  }
  0x44   :  { %535 = dma.done.wait [#allocation3], 128  }
  0x45   :  { %536 = vsyncadd [#allocation3], 4294967168 }
  0x46   :  { %537 = dma.done.wait [#allocation6], 768  }
  0x47   :  { %538 = vsyncadd [#allocation6], 4294966528 }
  0x48   :  { %539 = dma.done.wait [#allocation9], 512  }
  0x49   :  { %540 = vsyncadd [#allocation9], 4294966784  ;;  %v549_v0 = vmov 0.0   ;;  %vm550_vm0 = vmmov 0   ;;  %v415_v1 = vld [vmem:[#allocation5] sm:$0xff]   ;;  %v416_v2 = vld [vmem:[#allocation5 + $0x8] sm:$0xff]   ;;  %v319_v29 = vlaneseq }
  0x4a   :  { %374 = vmatprep.subr.bf16.mxu0 %v549_v0  ;;  %378 = vmatprep.mubr.msk.bf16.mxu0 %vm550_vm0, %v549_v0  ;;  %v81_v3 = vld [vmem:[#allocation2] sm:$0xff]  ;;  %v417_v4 = vld [vmem:[#allocation7] sm:$0xff]   ;;  %vm106_vm1 = vcmask 261120   ;;  %v419_v7 = vld [vmem:[#allocation7 + $0x10] sm:$0xff]   ;;  %vm191_vm2 = vcmask 523264  }
  0x4b   :  { %382 = vmatprep.subr.bf16.mxu1 %v549_v0  ;;  %390 = vmatprep.mubr.msk.bf16.mxu1 %vm550_vm0, %v549_v0  ;;  %v418_v5 = vld [vmem:[#allocation7 + $0x8] sm:$0xff]   ;;  %v82_v6 = vpack.c.bf16 %v81_v3, %v81_v3  ;;  %v420_v8 = vld [vmem:[#allocation7 + $0x18] sm:$0xff]   ;;  %v421_v9 = vld [vmem:[#allocation8] sm:$0xff]   ;;  %v320_v30 = vand.u32 127, %v319_v29 }
  0x4c   :  { %375 = vmatpush3.bf16.msra.mxu0 %v415_v1  ;;  %383 = vmatpush3.bf16.msra.mxu1 %v417_v4  ;;  %v422_v10 = vld [vmem:[#allocation8 + $0x8] sm:$0xff]   ;;  %v423_v19 = vld [vmem:[#allocation8 + $0x10] sm:$0xff]   ;;  %v424_v20 = vld [vmem:[#allocation8 + $0x18] sm:$0xff]  }
  0x4d   :  { %376 = vmatprep.subr.bf16.mxu0 %v549_v0  ;;  %384 = vmatprep.subr.bf16.mxu1 %v549_v0  ;;  %v345_v11 = vld [vmem:[%s677_s2] ss:$0 sm:$0xff]  ;;  %vm321_vm3 = vcmp.ge.s32.totalorder %v320_v30, 8  ;;  %vm322_vm4 = vcmp.lt.s32.totalorder %v320_v30, 16 }
  0x4e   :  { %v349_v21 = vld [vmem:[%s679_s4] ss:$0 sm:$0xff]  ;;  %s551_s4 = smov [#allocation10]   ;;  %vm323_vm5 = vmand %vm321_vm3, %vm322_vm4 }
  0x4f   :  { %v355_v31 = vld [vmem:[%s681_s6] ss:$0 sm:$0xff]  ;;  %s334_s28 = sshll.u32 %s551_s4, 4  ;;  %s335_s28 = int_to_ptr.vmem [resolvable:$true] %s334_s28 }
  0x50   :  { %377 = vmatpush3.bf16.msra.mxu0 %v416_v2  ;;  %385 = vmatpush3.bf16.msra.mxu1 %v418_v5  ;;  %s513_s29 = scalar_lea.vmem %s335_s28, 128  ;;  %p518_p5 = scmp.lt.s32.totalorder %s335_s28, %s335_s28 }
  0x51   :  { %394 = vmatprep.subr.bf16.mxu0 %v549_v0  ;;  %386 = vmatprep.subr.bf16.mxu1 %v549_v0  ;;  %p514_p4 = scmp.ne.s32.totalorder %s335_s28, %s513_s29  ;;  %p519_p6 = scmp.lt.s32.totalorder %s513_s29, %s513_s29 }
  0x53   :  { %379 = vmatmul.mubr.msk.bf16.vlgmr.msra.gmra.mrb[0].mxu0 %vm106_vm1, %v82_v6  ;;  %p520_p7 = por %p519_p6, %p518_p5 }
  0x54   :  { %402 = vmatprep.mubr.msk.bf16.mxu0 %vm550_vm0, %v549_v0  ;;  %387 = vmatpush3.bf16.msra.mxu1 %v419_v7 }
  0x55   :  { %388 = vmatprep.subr.bf16.mxu1 %v549_v0  ;;  %395 = vmatpush3.bf16.msra.mxu0 %v421_v9  ;;  %p521_p8 = pnand %p520_p7, %p514_p4 }
  0x56   :  { %396 = vmatprep.subr.bf16.mxu0 %v549_v0 }
  0x58   :  { %389 = vmatpush3.bf16.msra.mxu1 %v420_v8 }
  0x59   :  { %397 = vmatpush3.bf16.msra.mxu0 %v422_v10 }
  0x5a   :  { %398 = vmatprep.subr.bf16.mxu0 %v549_v0 }
  0x5d   :  { %399 = vmatpush3.bf16.msra.mxu0 %v423_v19 }
  0x5e   :  { %400 = vmatprep.subr.bf16.mxu0 %v549_v0 }
  0x61   :  { %401 = vmatpush3.bf16.msra.mxu0 %v424_v20 }
 0x126   :  { %v144_v12 = vpop.f32.mrb[0].mxu0 }
 0x127   :  { %v145_v13 = vadd.f32 %v345_v11, %v144_v12  ;;  %v380_v14 = vpop.f32.mrb[1].mxu0 }
 0x128   :  { %v147_v15 = vpop.f32.mrb[2].mxu0 }
 0x129   :  { %v150_v16 = vmax.f32 %v145_v13, 0.0  ;;  %v381_v17 = vpop.f32.mrb[3].mxu0 }
 0x12b   :  { %v151_v18 = vpack.c.bf16 %v150_v16, %v150_v16 }
 0x12d   :  { %391 = vmatmul.mubr.msk.bf16.vlgmr.msra.gmra.mrb[0].mxu1 %vm191_vm2, %v151_v18 }
 0x200   :  { %v229_v22 = vpop.f32.mrb[0].mxu1 }
 0x201   :  { %v230_v23 = vadd.f32 %v349_v21, %v229_v22  ;;  %v392_v24 = vpop.f32.mrb[1].mxu1 }
 0x202   :  { %v232_v25 = vpop.f32.mrb[2].mxu1 }
 0x203   :  { %v235_v26 = vmax.f32 %v230_v23, 0.0  ;;  %v393_v27 = vpop.f32.mrb[3].mxu1 }
 0x205   :  { %v236_v28 = vpack.c.bf16 %v235_v26, %v235_v26 }
 0x207   :  { %403 = vmatmul.mubr.msk.bf16.vlgmr.msra.gmra.mrb[4].mxu0 %vm191_vm2, %v236_v28 }
 0x2da   :  { %v313_v32 = vpop.f32.mrb[4].mxu0 }
 0x2db   :  { %v314_v33 = vadd.f32 %v355_v31, %v313_v32  ;;  %v404_v34 = vpop.f32.mrb[5].mxu0 }
 0x2dc   :  { %v316_v35 = vpop.f32.mrb[6].mxu0 }
 0x2dd   :  { %v324_v36 = vmax.f32 %v314_v33, -20.0  ;;  %v405_v37 = vpop.f32.mrb[7].mxu0 }
 0x2df   :  { %v325_v38 = vmin.f32 %v324_v36, 2.0 }
 0x2e1   :  { %v326_v39 = vsel %vm323_vm5, %v325_v38, %v314_v33 }
 0x2e2   :  { %327 = vst [vmem:[#allocation10] sm:$0xff] %v326_v39 }
 0x2e3   :  { %524 = shalt.err (!%p521_p8)
}
 0x2e4   :  { %s525_s8 = scalar_lea.hbm %s682_s7, 128 }
 0x2e5   :  { %p526_p9 = scmp.ne.s32.totalorder %s682_s7, %s525_s8  ;;  %p529_p10 = scmp.lt.u32.totalorder %s525_s8, %s682_s7 }
 0x2e7   :  { %p531_p11 = pnand %p529_p10, %p526_p9 }
 0x2e9   :  { %534 = shalt.err (!%p531_p11)
}
 0x2ea   :  { %337 = dma.vmem_to_hbm [thread:$0]  %s335_s28, 128, %s682_s7, [#allocation4]  }
 0x2eb   :  { %541 = dma.done.wait [#allocation4], 128  }
 0x2ec   :  { %542 = vsyncadd [#allocation4], 4294967168 }
 0x2ed   :  { %341 = vsyncpa [#allocation3], 1 }
 0x2ee   :  { %342 = vsyncpa [#allocation6], 1 }
 0x2ef   :  { %343 = vsyncpa [#allocation9], 1 }
 0x2f0   :  { %344 = vsyncpa [#allocation4], 1 }

</bundles_post_ra>
